<compile_context>
chip_gen: v7x
topology: tpu7x:2x2x1
jax: 0.10.0
libtpu: 0.0.40
codegen_flags: <defaults>
</compile_context>

<pallas_src>
import jax
import jax.numpy as jnp
from jax.experimental import pallas as pl
from jax.experimental.pallas import tpu as pltpu

_TM_CAP = 512
_TN_CAP = 512
_TK_CAP = 2048
_VMEM_TILE_BUDGET = 24 * 1024 * 1024      # double-buffered tile bytes (v7x-safe)
_VMEM_LIMIT_BYTES = 32 * 1024 * 1024      # scoped VMEM limit (v5e..v7x safe)


def _round_up(x: int, m: int) -> int:
    return ((x + m - 1) // m) * m


def _largest_divisor_tile(dim: int, align: int, cap: int) -> int:
    """Largest d with d | dim, d % align == 0, d <= cap (dim % align == 0)."""
    q = dim // align
    s_max = max(1, min(q, cap // align))
    for s in range(s_max, 0, -1):
        if q % s == 0:
            return s * align
    return align


def _choose_tiles(Bp, Np, Kp, x_isz, w_isz, o_isz):
    # Prefer splitting N into >=2 blocks (keeps both v7x TCs busy and splits
    # the dominant W stream); otherwise try to split M.
    tn_cap = min(_TN_CAP, Np // 2) if Np >= 256 else _TN_CAP
    tn = _largest_divisor_tile(Np, 128, tn_cap)

    tm_cap = _TM_CAP
    if Np // tn < 2 and Bp >= 16:
        tm_cap = min(_TM_CAP, Bp // 2)
    tm = _largest_divisor_tile(Bp, 8, tm_cap)

    def fits(tk):
        n_k = Kp // tk
        buf = 2 * (tm * tk * x_isz + tk * tn * w_isz)   # double-buffered inputs
        buf += 2 * tm * tn * o_isz                      # double-buffered output
        buf += 2 * tn * 4                               # bias (tiny)
        if n_k > 1:
            buf += tm * tn * 4                          # resident f32 accumulator
        return buf <= _VMEM_TILE_BUDGET

    if fits(Kp):
        tk = Kp                                          # single K step preferred
    else:
        tk = 128
        q = Kp // 128
        for s in range(min(q, _TK_CAP // 128), 0, -1):
            if q % s == 0 and fits(s * 128):
                tk = s * 128
                break
    return tm, tn, tk


def _sigmoid_f32(z):
    # exp and approx reciprocal both go to the EUP slot; VALU stays free.
    return pl.reciprocal(1.0 + jnp.exp(-z), approx=True)


def _linear_sigmoid_kernel(x_ref, w_ref, b_ref, o_ref):
    """Single-K-step path: fused matmul + bias + sigmoid, no scratch."""
    z = jnp.dot(x_ref[...], w_ref[...], preferred_element_type=jnp.float32)
    z = z + b_ref[...]                          # (1, tn) broadcast over rows
    o_ref[...] = _sigmoid_f32(z).astype(o_ref.dtype)


def _linear_sigmoid_kernel_acc(x_ref, w_ref, b_ref, o_ref, acc_ref):
    """Multi-K-step path: bias-seeded resident f32 accumulator."""
    k = pl.program_id(2)

    @pl.when(k == 0)
    def _init():
        # Seed with the broadcast bias -> no separate bias add in finalize.
        acc_ref[...] = pl.broadcast_to(
            b_ref[...].astype(jnp.float32), acc_ref.shape)

    acc_ref[...] += jnp.dot(
        x_ref[...], w_ref[...], preferred_element_type=jnp.float32)

    @pl.when(k == pl.num_programs(2) - 1)
    def _finalize():
        o_ref[...] = _sigmoid_f32(acc_ref[...]).astype(o_ref.dtype)


def prepare_params(w, b, *, dtype=None):
    """One-time (outside the hot path) padding of the Linear parameters.

    w: (in_dim, out_dim)   -- transpose of PyTorch nn.Linear's (out_dim, in_dim)
    b: (out_dim,)
    dtype: optional compute dtype for W (e.g. jnp.bfloat16 to halve HBM traffic;
           accuracy tradeoff is the caller's choice). Bias stays f32.
    Returns wp: (Kp, Np), bp: (1, Np) f32 with Kp/Np multiples of 128.
    """
    in_dim, out_dim = w.shape
    if b.shape != (out_dim,):
        raise ValueError(f"b must have shape ({out_dim},); got {b.shape}")
    Kp = _round_up(in_dim, 128)
    Np = _round_up(out_dim, 128)
    wp = jnp.pad(w, ((0, Kp - in_dim), (0, Np - out_dim)))
    if dtype is not None:
        wp = wp.astype(dtype)
    bp = jnp.pad(b.astype(jnp.float32), (0, Np - out_dim)).reshape(1, Np)
    return wp, bp


def classifier_ssl_forward(x, w_padded, b_padded, *, out_dim,
                           tm=None, tn=None, tk=None):
    """x: (B, in_dim), w_padded: (Kp, Np), b_padded: (1, Np). Returns (B, out_dim)."""
    B, in_dim = x.shape
    Kp, Np = w_padded.shape
    if Kp % 128 or Np % 128:
        raise ValueError("w_padded must be 128-aligned; use prepare_params().")
    if in_dim > Kp or out_dim > Np:
        raise ValueError("w_padded is smaller than the logical (in_dim, out_dim).")
    if b_padded.shape != (1, Np):
        raise ValueError(f"b_padded must have shape (1, {Np}); got {b_padded.shape}")

    Bp = _round_up(B, 8)
    out_dtype = x.dtype

    # Hot-path padding touches only x (small relative to W); cast x to the
    # compute dtype chosen for W (f32 by default, bf16 if prepared that way).
    xp = x.astype(w_padded.dtype) if x.dtype != w_padded.dtype else x
    if (Bp, Kp) != (B, in_dim):
        xp = jnp.pad(xp, ((0, Bp - B), (0, Kp - in_dim)))

    a_tm, a_tn, a_tk = _choose_tiles(
        Bp, Np, Kp,
        xp.dtype.itemsize, w_padded.dtype.itemsize, jnp.dtype(out_dtype).itemsize)
    tm = a_tm if tm is None else tm
    tn = a_tn if tn is None else tn
    tk = a_tk if tk is None else tk
    if Bp % tm or Np % tn or Kp % tk:
        raise ValueError(f"tiles ({tm},{tn},{tk}) must divide padded dims "
                         f"({Bp},{Np},{Kp})")

    cost = pl.CostEstimate(
        flops=2 * Bp * Kp * Np,
        transcendentals=Bp * Np,
        bytes_accessed=(Bp * Kp * xp.dtype.itemsize
                        + Kp * Np * w_padded.dtype.itemsize
                        + Np * b_padded.dtype.itemsize
                        + Bp * Np * jnp.dtype(out_dtype).itemsize),
    )

    n_k = Kp // tk
    if n_k == 1:
        # Fully parallel 2-D grid, no accumulator, no pl.when.
        grid_spec = pltpu.PrefetchScalarGridSpec(
            num_scalar_prefetch=0,
            grid=(Bp // tm, Np // tn),
            in_specs=[
                pl.BlockSpec((tm, Kp), lambda i, j: (i, 0)),
                pl.BlockSpec((Kp, tn), lambda i, j: (0, j)),
                pl.BlockSpec((1, tn), lambda i, j: (0, j)),
            ],
            out_specs=pl.BlockSpec((tm, tn), lambda i, j: (i, j)),
        )
        kernel = _linear_sigmoid_kernel
        dim_sem = ("parallel", "parallel")
    else:
        grid_spec = pltpu.PrefetchScalarGridSpec(
            num_scalar_prefetch=0,
            grid=(Bp // tm, Np // tn, n_k),
            in_specs=[
                pl.BlockSpec((tm, tk), lambda i, j, k: (i, k)),
                pl.BlockSpec((tk, tn), lambda i, j, k: (k, j)),
                pl.BlockSpec((1, tn), lambda i, j, k: (0, j)),
            ],
            out_specs=pl.BlockSpec((tm, tn), lambda i, j, k: (i, j)),
            scratch_shapes=[pltpu.VMEM((tm, tn), jnp.float32)],
        )
        kernel = _linear_sigmoid_kernel_acc
        dim_sem = ("parallel", "parallel", "arbitrary")

    out_padded = pl.pallas_call(
        kernel,
        out_shape=jax.ShapeDtypeStruct((Bp, Np), out_dtype),
        grid_spec=grid_spec,
        compiler_params=pltpu.CompilerParams(
            dimension_semantics=dim_sem,
            vmem_limit_bytes=_VMEM_LIMIT_BYTES,
        ),
        cost_estimate=cost,
    )(xp, w_padded, b_padded)

    return out_padded[:B, :out_dim]


def init_params(key, in_dim, out_dim):
    """Deterministic init mimicking nn.Linear (uniform(-1/sqrt(in), 1/sqrt(in)))."""
    kw, kb = jax.random.split(key)
    bound = 1.0 / jnp.sqrt(jnp.float32(in_dim))
    # PyTorch stores weight as (out_dim, in_dim); we keep the transposed layout.
    w = jax.random.uniform(kw, (in_dim, out_dim), jnp.float32, -bound, bound)
    b = jax.random.uniform(kb, (out_dim,), jnp.float32, -bound, bound)
    return w, b


if __name__ == "__main__":
    key = jax.random.PRNGKey(0)
    k_x, k_p = jax.random.split(key)

    # Small demo shapes consistent with classifierSSL(in_dim=32, out_dim=16).
    B, in_dim, out_dim = 8, 32, 16
    x = jax.random.normal(k_x, (B, in_dim), jnp.float32)
    w, b = init_params(k_p, in_dim, out_dim)
    wp, bp = prepare_params(w, b)          # one-time padding, outside the jit

    fwd = jax.jit(classifier_ssl_forward,
                  static_argnames=("out_dim", "tm", "tn", "tk"))
    out = fwd(x, wp, bp, out_dim=out_dim)
    jax.block_until_ready(out)

    ref = jax.nn.sigmoid(x @ w + b)
    assert out.shape == (B, out_dim)
    # Tolerance accounts for the EUP approx reciprocal (~2^-12 relative).
    assert jnp.allclose(out, ref, atol=5e-3, rtol=5e-3), float(
        jnp.max(jnp.abs(out - ref)))

    # Ragged multi-tile check: Bp=136, Kp=640, Np=384 -> single K step,
    # 3 N blocks (>=2 parallel blocks for v7x), divisor tiles (no over-pad).
    B2, in2, out2 = 136, 640, 272
    k1, k2 = jax.random.split(k_x)
    x2 = jax.random.normal(k1, (B2, in2), jnp.float32)
    w2, b2 = init_params(k2, in2, out2)
    wp2, bp2 = prepare_params(w2, b2)
    out2_ = fwd(x2, wp2, bp2, out_dim=out2)
    jax.block_until_ready(out2_)
    ref2 = jax.nn.sigmoid(x2 @ w2 + b2)
    assert out2_.shape == (B2, out2)
    assert jnp.allclose(out2_, ref2, atol=5e-3, rtol=5e-3), float(
        jnp.max(jnp.abs(out2_ - ref2)))

    # Force the multi-K-step path (bias-seeded resident accumulator).
    out3_ = classifier_ssl_forward(x2, wp2, bp2, out_dim=out2, tk=128)
    jax.block_until_ready(out3_)
    assert jnp.allclose(out3_, ref2, atol=5e-3, rtol=5e-3), float(
        jnp.max(jnp.abs(out3_ - ref2)))

    print("KERNEL_OK")
</pallas_src>

<mosaic_0001>
module attributes {stable_mosaic.version = 11 : i64} {
  func.func @_linear_sigmoid_kernel(%arg0: i32, %arg1: i32, %arg2: memref<8x128xf32, #tpu.memory_space<vmem>>, %arg3: memref<128x128xf32, #tpu.memory_space<vmem>>, %arg4: memref<1x128xf32, #tpu.memory_space<vmem>>, %arg5: memref<8x128xf32, #tpu.memory_space<vmem>>) attributes {dimension_semantics = [#tpu.dimension_semantics<parallel>, #tpu.dimension_semantics<parallel>], iteration_bounds = array<i64: 1, 1>, scalar_prefetch = 0 : i64, scratch_operands = 0 : i64, tpu.core_type = #tpu.core_type<tc>, window_params = [{transform_indices = @transform_0, window_bounds = array<i64: 8, 128>}, {transform_indices = @transform_1, window_bounds = array<i64: 128, 128>}, {transform_indices = @transform_2, window_bounds = array<i64: 1, 128>}, {transform_indices = @transform_3, window_bounds = array<i64: 8, 128>}]} {
    %c0 = arith.constant 0 : index
    %c0_0 = arith.constant 0 : index
    %0 = vector.load %arg2[%c0, %c0_0] : memref<8x128xf32, #tpu.memory_space<vmem>>, vector<8x128xf32>
    %c0_1 = arith.constant 0 : index
    %c0_2 = arith.constant 0 : index
    %1 = vector.load %arg3[%c0_1, %c0_2] : memref<128x128xf32, #tpu.memory_space<vmem>>, vector<128x128xf32>
    %cst = arith.constant dense<0.000000e+00> : vector<8x128xf32>
    %2 = tpu.matmul %0, %1, %cst {dimension_numbers = #tpu.dot_dimension_numbers<[1], [0], [0], [1], [0, 0, 1, 1], [], []>} : vector<8x128xf32>, vector<128x128xf32>, vector<8x128xf32> -> vector<8x128xf32>
    %c0_3 = arith.constant 0 : index
    %c0_4 = arith.constant 0 : index
    %3 = vector.load %arg4[%c0_3, %c0_4] : memref<1x128xf32, #tpu.memory_space<vmem>>, vector<1x128xf32>
    %4 = vector.broadcast %3 : vector<1x128xf32> to vector<8x128xf32>
    %5 = arith.addf %2, %4 : vector<8x128xf32>
    %cst_5 = arith.constant 0.000000e+00 : f32
    %6 = vector.broadcast %cst_5 : f32 to vector<8x128xf32>
    %7 = arith.subf %6, %5 : vector<8x128xf32>
    %8 = math.exp %7 : vector<8x128xf32>
    %cst_6 = arith.constant 1.000000e+00 : f32
    %9 = vector.broadcast %cst_6 : f32 to vector<8x128xf32>
    %10 = arith.addf %9, %8 : vector<8x128xf32>
    %11 = tpu.reciprocal %10 {approx = true} : vector<8x128xf32> -> vector<8x128xf32>
    %c0_7 = arith.constant 0 : index
    %c0_8 = arith.constant 0 : index
    %12 = vector.load %arg5[%c0_7, %c0_8] : memref<8x128xf32, #tpu.memory_space<vmem>>, vector<8x128xf32>
    tpu.vector_store %arg5[%c0_7, %c0_8], %11 {strides = array<i32>} : memref<8x128xf32, #tpu.memory_space<vmem>>, vector<8x128xf32>,
    return
  }
  func.func @transform_0(%arg0: i32, %arg1: i32) -> (i32, i32) {
    %c0_i32 = arith.constant 0 : i32
    %c0_i32_0 = arith.constant 0 : i32
    return %arg0, %c0_i32 : i32, i32
  }
  func.func @transform_1(%arg0: i32, %arg1: i32) -> (i32, i32) {
    %c0_i32 = arith.constant 0 : i32
    %c0_i32_0 = arith.constant 0 : i32
    return %c0_i32, %arg1 : i32, i32
  }
  func.func @transform_2(%arg0: i32, %arg1: i32) -> (i32, i32) {
    %c0_i32 = arith.constant 0 : i32
    %c0_i32_0 = arith.constant 0 : i32
    return %c0_i32, %arg1 : i32, i32
  }
  func.func @transform_3(%arg0: i32, %arg1: i32) -> (i32, i32) {
    %c0_i32 = arith.constant 0 : i32
    return %arg0, %arg1 : i32, i32
  }
}

</mosaic_0001>

<bundles_post_ra>
// kernel: classifier_ssl_forward.1
= control target key start
LH: loop header
LB: loop body
LE: loop exit
PB: predicated region body
PF: predicated region fallthrough
CT: control target
= control target key end

     0   :  { %8 = vsyncpa [#allocation3], 0  ;;  %s337_s0 = inlined_call_operand.vmem [shape: f32[8,128], index: 0, kind: input, shape index: {}]   ;;  %s338_s1 = inlined_call_operand.hbm [shape: f32[128,128], index: 1, kind: input, shape index: {}]   ;;  %s339_s2 = inlined_call_operand.vmem [shape: f32[1,128], index: 2, kind: input, shape index: {}]   ;;  %s340_s3 = inlined_call_operand.hbm [shape: f32[8,128], index: 3, kind: output, shape index: {}]  }
   0x1   :  { %9 = vsyncpa [#allocation4], 0  ;;  %s280_s12 = smov [#allocation2]   ;;  %s232_s16 = scalar_lea.hbm %s338_s1, 2048 }
   0x2   :  { %s17_s13 = sshll.u32 %s280_s12, 4  ;;  %p233_p0 = scmp.ne.s32.totalorder %s338_s1, %s232_s16  ;;  %s18_s13 = int_to_ptr.vmem [resolvable:$true] %s17_s13 }
   0x3   :  { %p236_p1 = scmp.lt.u32.totalorder %s232_s16, %s338_s1 }
   0x5   :  { %p238_p2 = pnand %p236_p1, %p233_p0 }
   0x7   :  { %241 = shalt.err (!%p238_p2)
}
   0x8   :  { %s242_s21 = scalar_lea.vmem %s18_s13, 2048  ;;  %p247_p4 = scmp.lt.s32.totalorder %s18_s13, %s18_s13 }
   0x9   :  { %p243_p3 = scmp.ne.s32.totalorder %s18_s13, %s242_s21  ;;  %p248_p5 = scmp.lt.s32.totalorder %s242_s21, %s242_s21 }
   0xb   :  { %p249_p6 = por %p248_p5, %p247_p4 }
   0xd   :  { %p250_p7 = pnand %p249_p6, %p243_p3 }
   0xf   :  { %253 = shalt.err (!%p250_p7)
}
  0x10   :  { %s281_s22 = smov 128   ;;  %s282_s23 = smov 8  }
  0x11   :  { %23 = dma.hbm_to_vmem [thread:$0]  %s338_s1, 2048, %s18_s13, [#allocation3], %s281_s22, %s281_s22, %s282_s23  }
  0x12   :  { %276 = dma.done.wait [#allocation3], 2048  }
  0x13   :  { %277 = vsyncadd [#allocation3], 4294965248  ;;  %v283_v0 = vmov 0.0|0.0   ;;  %vm284_vm0 = vmmov 0   ;;  %v285_v1 = vmov 0.0   ;;  %v30_v2 = vld [vmem:[#allocation2] sm:$0xff] }
  0x14   :  { %197 = vmatprep.subr.bf16.mxu0 %v283_v0  ;;  %194 = vmatprep.mubr.msk.f32.mxu0 %vm284_vm0, %v285_v1  ;;  %v31_v3 = vld [vmem:[#allocation2 + $0x8] sm:$0xff]  ;;  %v32_v4 = vld [vmem:[#allocation2 + $0x10] sm:$0xff]  ;;  %v33_v6 = vld [vmem:[#allocation2 + $0x18] sm:$0xff]  ;;  %s286_s29 = smov [#allocation5]  }
  0x15   :  { %v198_v5 = vpack.c.bf16 %v31_v3, %v30_v2  ;;  %v201_v7 = vpack.c.bf16 %v33_v6, %v32_v4  ;;  %v34_v8 = vld [vmem:[#allocation2 + $0x20] sm:$0xff]  ;;  %v35_v9 = vld [vmem:[#allocation2 + $0x28] sm:$0xff]  ;;  %v36_v11 = vld [vmem:[#allocation2 + $0x30] sm:$0xff]  ;;  %s135_s30 = sshll.u32 %s286_s29, 4  ;;  %s136_s30 = int_to_ptr.vmem [resolvable:$true] %s135_s30 }
  0x16   :  { %v204_v10 = vpack.c.bf16 %v35_v9, %v34_v8  ;;  %v37_v12 = vld [vmem:[#allocation2 + $0x38] sm:$0xff]  ;;  %v38_v14 = vld [vmem:[#allocation2 + $0x40] sm:$0xff]  ;;  %v39_v15 = vld [vmem:[#allocation2 + $0x48] sm:$0xff]  ;;  %p259_p9 = scmp.lt.s32.totalorder %s136_s30, %s136_s30 }
  0x17   :  { %199 = vmatpush3.bf16.msra.mxu0 %v198_v5  ;;  %v207_v13 = vpack.c.bf16 %v37_v12, %v36_v11  ;;  %v210_v16 = vpack.c.bf16 %v39_v15, %v38_v14  ;;  %v40_v17 = vld [vmem:[#allocation2 + $0x50] sm:$0xff]  ;;  %v41_v18 = vld [vmem:[#allocation2 + $0x58] sm:$0xff]  ;;  %v42_v20 = vld [vmem:[#allocation2 + $0x60] sm:$0xff] }
  0x18   :  { %200 = vmatprep.subr.bf16.mxu0 %v283_v0  ;;  %v213_v19 = vpack.c.bf16 %v41_v18, %v40_v17  ;;  %v43_v21 = vld [vmem:[#allocation2 + $0x68] sm:$0xff]  ;;  %v44_v23 = vld [vmem:[#allocation2 + $0x70] sm:$0xff]  ;;  %v45_v24 = vld [vmem:[#allocation2 + $0x78] sm:$0xff] }
  0x19   :  { %v216_v22 = vpack.c.bf16 %v43_v21, %v42_v20  ;;  %v219_v25 = vpack.c.bf16 %v45_v24, %v44_v23  ;;  %v29_v26 = vld [vmem:[%s337_s0] sm:$0xff]  ;;  %s254_s0 = scalar_lea.vmem %s136_s30, 128 }
  0x1a   :  { %v144_v27 = vld [vmem:[%s339_s2] ss:$0 sm:$0xff]  ;;  %p255_p8 = scmp.ne.s32.totalorder %s136_s30, %s254_s0  ;;  %p260_p10 = scmp.lt.s32.totalorder %s254_s0, %s254_s0 }
  0x1b   :  { %202 = vmatpush3.bf16.msra.mxu0 %v201_v7 }
  0x1c   :  { %203 = vmatprep.subr.bf16.mxu0 %v283_v0  ;;  %p261_p11 = por %p260_p10, %p259_p9 }
  0x1e   :  { %p262_p12 = pnand %p261_p11, %p255_p8 }
  0x1f   :  { %205 = vmatpush3.bf16.msra.mxu0 %v204_v10 }
  0x20   :  { %206 = vmatprep.subr.bf16.mxu0 %v283_v0 }
  0x23   :  { %208 = vmatpush3.bf16.msra.mxu0 %v207_v13 }
  0x24   :  { %209 = vmatprep.subr.bf16.mxu0 %v283_v0 }
  0x27   :  { %211 = vmatpush3.bf16.msra.mxu0 %v210_v16 }
  0x28   :  { %212 = vmatprep.subr.bf16.mxu0 %v283_v0 }
  0x2b   :  { %214 = vmatpush3.bf16.msra.mxu0 %v213_v19 }
  0x2c   :  { %215 = vmatprep.subr.bf16.mxu0 %v283_v0 }
  0x2f   :  { %217 = vmatpush3.bf16.msra.mxu0 %v216_v22 }
  0x30   :  { %218 = vmatprep.subr.bf16.mxu0 %v283_v0 }
  0x33   :  { %220 = vmatpush3.bf16.msra.mxu0 %v219_v25 }
  0x36   :  { %195 = vmatmul.mubr.f32.vlgmr.msra.gmra.mrb[0].mxu0 %v29_v26 }
 0x109   :  { %v119_v28 = vpop.f32.mrb[0].mxu0 }
 0x10a   :  { %v120_v29 = vadd.f32 %v144_v27, %v119_v28  ;;  %v196_v30 = vpop.f32.mrb[1].mxu0 }
 0x10c   :  { %v123_v31 = vsub.f32 0.0, %v120_v29 }
 0x10e   :  { %v124_v32 = vmul.f32 1.442695, %v123_v31 }
 0x110   :  { %228 = vpow2.f32 %v124_v32 }
 0x11a   :  { %v229_v33 = vpop.eup %228 }
 0x11b   :  { %v126_v34 = vadd.f32 1.0, %v229_v33 }
 0x11d   :  { %230 = vrcp.f32 %v126_v34 }
 0x127   :  { %v231_v35 = vpop.eup %230 }
 0x128   :  { %128 = vst [vmem:[#allocation5] sm:$0xff] %v231_v35 }
 0x129   :  { %265 = shalt.err (!%p262_p12)
}
 0x12a   :  { %s266_s5 = scalar_lea.hbm %s340_s3, 128 }
 0x12b   :  { %p267_p13 = scmp.ne.s32.totalorder %s340_s3, %s266_s5  ;;  %p270_p0 = scmp.lt.u32.totalorder %s266_s5, %s340_s3 }
 0x12d   :  { %p272_p1 = pnand %p270_p0, %p267_p13 }
 0x12f   :  { %275 = shalt.err (!%p272_p1)
}
 0x130   :  { %138 = dma.vmem_to_hbm [thread:$0]  %s136_s30, 128, %s340_s3, [#allocation4]  }
 0x131   :  { %278 = dma.done.wait [#allocation4], 128  }
 0x132   :  { %279 = vsyncadd [#allocation4], 4294967168 }
 0x133   :  { %142 = vsyncpa [#allocation3], 1 }
 0x134   :  { %143 = vsyncpa [#allocation4], 1 }

</bundles_post_ra>
